<compile_context>
chip_gen: v7x
topology: tpu7x:2x2x1
jax: 0.10.0
libtpu: 0.0.40
codegen_flags: <defaults>
</compile_context>

<pallas_src>
import jax
import jax.numpy as jnp
from jax.experimental import pallas as pl
from jax.experimental.pallas import tpu as pltpu


def _pe_symmetry_kernel(x_ref, w_ind_ref, w_max_ref, w_mean_ref, b_ref, o_ref):
    """One grid step == a block of Bt independent permutation-equivariant sets.

    x_ref      : (Bt, N, in_dim)
    w_*_ref    : (in_dim, out_dim)   pre-transposed Linear weights
    b_ref      : (1, out_dim)
    o_ref      : (Bt, N, out_dim)
    """
    bt, n, in_dim = x_ref.shape
    out_dim = o_ref.shape[-1]
    cdt = w_ind_ref.dtype

    x = x_ref[...]                                                  # (bt, n, in_dim)

    # Per-set statistics over the set/agent axis (axis=1).
    # max is exact in the native dtype; mean accumulates in f32 (no-op cast
    # when x is already f32, so no extra full-tile temp in the default config).
    x_max = jnp.max(x, axis=1)                                      # (bt, in_dim)
    x_mean = jnp.sum(x.astype(jnp.float32), axis=1) * (1.0 / n)     # (bt, in_dim)

    # Pooled projections (tiny MXU matmuls, M = bt) + bias, accumulated in f32.
    pooled = (
        jnp.dot(x_max.astype(cdt), w_max_ref[...],
                preferred_element_type=jnp.float32)
        + jnp.dot(x_mean.astype(cdt), w_mean_ref[...],
                  preferred_element_type=jnp.float32)
        + b_ref[...].astype(jnp.float32))                           # (bt, out_dim)

    # Per-element projection: one matmul over all bt*n rows (fills the MXU M
    # dimension).  When n % 8 == 0 the reshapes are layout no-ops.
    y = jnp.dot(x.reshape(bt * n, in_dim).astype(cdt), w_ind_ref[...],
                preferred_element_type=jnp.float32)                 # (bt*n, out_dim)
    y = y.reshape(bt, n, out_dim) + pooled[:, None, :]              # broadcast over n
    o_ref[...] = y.astype(o_ref.dtype)


def make_pe_symmetry_mean_max(w_individual, b_individual, w_max, w_mean,
                              compute_dtype=None):
    """One-time parameter prep (transposes hoisted), returns apply(x).

    w_*: (out_dim, in_dim) in PyTorch Linear convention; b: (out_dim,).
    apply(x) accepts x of shape (N, in_dim) (exact module semantics) or
    (B, N, in_dim) (module applied independently to each set).
    """
    out_dim, in_dim = w_individual.shape
    cdt = (jnp.asarray(w_individual).dtype if compute_dtype is None
           else jnp.dtype(compute_dtype))

    # Pre-transposed weights; no lane padding (full-array dims satisfy the
    # (8,128) rule and padding only inflates HBM traffic on a mem-bound kernel).
    w_ind_t = jnp.asarray(w_individual, cdt).T        # (in_dim, out_dim)
    w_max_t = jnp.asarray(w_max, cdt).T               # (in_dim, out_dim)
    w_mean_t = jnp.asarray(w_mean, cdt).T             # (in_dim, out_dim)
    b_row = jnp.asarray(b_individual, jnp.float32).reshape(1, out_dim)

    # Conservative VMEM budgets that hold on v5e/v6e (128 MiB) and v7x (64 MiB).
    VMEM_LIMIT = 48 * 1024 * 1024
    ACT_BUDGET = 28 * 1024 * 1024

    @jax.jit
    def apply(x):
        squeeze = (x.ndim == 2)
        xb = x[None] if squeeze else x                # (B, N, in_dim)
        B, N, _ = xb.shape
        x_bytes = jnp.dtype(xb.dtype).itemsize
        w_bytes = jnp.dtype(cdt).itemsize

        # How many sets per grid step: as many as fit the activation budget
        # (double-buffered x/out blocks + f32 working copies, generous bound).
        per_set = N * (2 * in_dim * x_bytes           # double-buffered x block
                       + 2 * out_dim * x_bytes        # double-buffered out block
                       + 4 * (in_dim + out_dim))      # f32 working copies
        bt = max(1, min(B, ACT_BUDGET // max(per_set, 1)))
        grid_b = pl.cdiv(B, bt)

        rows = B * N
        cost = pl.CostEstimate(
            flops=(2 * rows * in_dim * out_dim            # individual matmul
                   + 4 * B * in_dim * out_dim             # two pooled matmuls
                   + 2 * rows * in_dim),                  # max + sum reductions
            transcendentals=0,
            bytes_accessed=(rows * in_dim * x_bytes       # x
                            + rows * out_dim * x_bytes    # out
                            + 3 * in_dim * out_dim * w_bytes
                            + out_dim * 4),
        )

        out = pl.pallas_call(
            _pe_symmetry_kernel,
            out_shape=jax.ShapeDtypeStruct((B, N, out_dim), x.dtype),
            grid=(grid_b,),                               # independent set-blocks
            in_specs=[
                pl.BlockSpec((bt, N, in_dim), lambda i: (i, 0, 0)),
                pl.BlockSpec((in_dim, out_dim), lambda i: (0, 0)),   # resident
                pl.BlockSpec((in_dim, out_dim), lambda i: (0, 0)),   # resident
                pl.BlockSpec((in_dim, out_dim), lambda i: (0, 0)),   # resident
                pl.BlockSpec((1, out_dim), lambda i: (0, 0)),        # resident
            ],
            out_specs=pl.BlockSpec((bt, N, out_dim), lambda i: (i, 0, 0)),
            compiler_params=pltpu.CompilerParams(
                dimension_semantics=("parallel",),        # sets are independent
                vmem_limit_bytes=VMEM_LIMIT,
            ),
            cost_estimate=cost,
        )(xb, w_ind_t, w_max_t, w_mean_t, b_row)

        return out[0] if squeeze else out

    return apply


def _reference(x, w_individual, b_individual, w_max, w_mean):
    xf = x.astype(jnp.float32)
    x_max = jnp.max(xf, axis=0, keepdims=True) @ w_max.T
    x_mean = jnp.mean(xf, axis=-2, keepdims=True) @ w_mean.T
    x_ind = xf @ w_individual.T + b_individual
    return x_ind + x_max + x_mean


if __name__ == "__main__":
    # Small shapes: sets of N=8 elements, in_dim=32, out_dim=64, batch of 4 sets.
    N, in_dim, out_dim = 8, 32, 64
    B = 4

    key = jax.random.PRNGKey(0)
    kx, kb, k1, k2, k3, k4 = jax.random.split(key, 6)

    bound = 1.0 / (in_dim ** 0.5)
    x = jax.random.normal(kx, (N, in_dim), dtype=jnp.float32)
    x_batched = jax.random.normal(kb, (B, N, in_dim), dtype=jnp.float32)
    w_individual = jax.random.uniform(k1, (out_dim, in_dim), jnp.float32, -bound, bound)
    b_individual = jax.random.uniform(k2, (out_dim,), jnp.float32, -bound, bound)
    w_max = jax.random.uniform(k3, (out_dim, in_dim), jnp.float32, -bound, bound)
    w_mean = jax.random.uniform(k4, (out_dim, in_dim), jnp.float32, -bound, bound)

    # One-time prep (hoisted transposes); returns a jitted apply().
    pe_apply = make_pe_symmetry_mean_max(w_individual, b_individual, w_max, w_mean)

    # Single set (exact PyTorch module semantics).
    out = jax.block_until_ready(pe_apply(x))
    ref = _reference(x, w_individual, b_individual, w_max, w_mean)
    assert out.shape == (N, out_dim)
    assert jnp.allclose(out, ref, atol=2e-5, rtol=2e-5), "single-set mismatch vs reference"

    # Batch of independent sets processed in one gridded pallas_call.
    out_b = jax.block_until_ready(pe_apply(x_batched))
    ref_b = jax.vmap(lambda xs: _reference(xs, w_individual, b_individual, w_max, w_mean))(x_batched)
    assert out_b.shape == (B, N, out_dim)
    assert jnp.allclose(out_b, ref_b, atol=2e-5, rtol=2e-5), "batched mismatch vs reference"

    print("KERNEL_OK")
</pallas_src>

<mosaic_0001>
module attributes {stable_mosaic.version = 11 : i64} {
  func.func @_pe_symmetry_kernel(%arg0: i32, %arg1: memref<1x8x32xf32, #tpu.memory_space<vmem>>, %arg2: memref<32x64xf32, #tpu.memory_space<vmem>>, %arg3: memref<32x64xf32, #tpu.memory_space<vmem>>, %arg4: memref<32x64xf32, #tpu.memory_space<vmem>>, %arg5: memref<1x64xf32, #tpu.memory_space<vmem>>, %arg6: memref<1x8x64xf32, #tpu.memory_space<vmem>>) attributes {dimension_semantics = [#tpu.dimension_semantics<parallel>], iteration_bounds = array<i64: 1>, scalar_prefetch = 0 : i64, scratch_operands = 0 : i64, tpu.core_type = #tpu.core_type<tc>, window_params = [{transform_indices = @transform_0, window_bounds = array<i64: 1, 8, 32>}, {pipeline_mode = #tpu.pipeline_mode<synchronous>, transform_indices = @transform_1, window_bounds = array<i64: 32, 64>}, {pipeline_mode = #tpu.pipeline_mode<synchronous>, transform_indices = @transform_2, window_bounds = array<i64: 32, 64>}, {pipeline_mode = #tpu.pipeline_mode<synchronous>, transform_indices = @transform_3, window_bounds = array<i64: 32, 64>}, {pipeline_mode = #tpu.pipeline_mode<synchronous>, transform_indices = @transform_4, window_bounds = array<i64: 1, 64>}, {transform_indices = @transform_5, window_bounds = array<i64: 1, 8, 64>}]} {
    %c0 = arith.constant 0 : index
    %c0_0 = arith.constant 0 : index
    %c0_1 = arith.constant 0 : index
    %0 = vector.load %arg1[%c0, %c0_0, %c0_1] : memref<1x8x32xf32, #tpu.memory_space<vmem>>, vector<1x8x32xf32>
    %cst = arith.constant dense<0xFF800000> : vector<1x32xf32>
    %1 = vector.multi_reduction <maximumf>, %0, %cst [1] : vector<1x8x32xf32> to vector<1x32xf32>
    %cst_2 = arith.constant dense<0.000000e+00> : vector<1x32xf32>
    %2 = vector.multi_reduction <add>, %0, %cst_2 [1] : vector<1x8x32xf32> to vector<1x32xf32>
    %cst_3 = arith.constant 1.250000e-01 : f32
    %3 = vector.broadcast %cst_3 : f32 to vector<1x32xf32>
    %4 = arith.mulf %2, %3 : vector<1x32xf32>
    %c0_4 = arith.constant 0 : index
    %c0_5 = arith.constant 0 : index
    %5 = vector.load %arg3[%c0_4, %c0_5] : memref<32x64xf32, #tpu.memory_space<vmem>>, vector<32x64xf32>
    %cst_6 = arith.constant dense<0.000000e+00> : vector<1x64xf32>
    %6 = tpu.matmul %1, %5, %cst_6 {dimension_numbers = #tpu.dot_dimension_numbers<[1], [0], [0], [1], [0, 0, 1, 1], [], []>} : vector<1x32xf32>, vector<32x64xf32>, vector<1x64xf32> -> vector<1x64xf32>
    %c0_7 = arith.constant 0 : index
    %c0_8 = arith.constant 0 : index
    %7 = vector.load %arg4[%c0_7, %c0_8] : memref<32x64xf32, #tpu.memory_space<vmem>>, vector<32x64xf32>
    %cst_9 = arith.constant dense<0.000000e+00> : vector<1x64xf32>
    %8 = tpu.matmul %4, %7, %cst_9 {dimension_numbers = #tpu.dot_dimension_numbers<[1], [0], [0], [1], [0, 0, 1, 1], [], []>} : vector<1x32xf32>, vector<32x64xf32>, vector<1x64xf32> -> vector<1x64xf32>
    %9 = arith.addf %6, %8 : vector<1x64xf32>
    %c0_10 = arith.constant 0 : index
    %c0_11 = arith.constant 0 : index
    %10 = vector.load %arg5[%c0_10, %c0_11] : memref<1x64xf32, #tpu.memory_space<vmem>>, vector<1x64xf32>
    %11 = arith.addf %9, %10 : vector<1x64xf32>
    %12 = vector.shape_cast %0 : vector<1x8x32xf32> to vector<8x32xf32>
    %c0_12 = arith.constant 0 : index
    %c0_13 = arith.constant 0 : index
    %13 = vector.load %arg2[%c0_12, %c0_13] : memref<32x64xf32, #tpu.memory_space<vmem>>, vector<32x64xf32>
    %cst_14 = arith.constant dense<0.000000e+00> : vector<8x64xf32>
    %14 = tpu.matmul %12, %13, %cst_14 {dimension_numbers = #tpu.dot_dimension_numbers<[1], [0], [0], [1], [0, 0, 1, 1], [], []>} : vector<8x32xf32>, vector<32x64xf32>, vector<8x64xf32> -> vector<8x64xf32>
    %15 = vector.shape_cast %14 : vector<8x64xf32> to vector<1x8x64xf32>
    %16 = vector.shape_cast %11 : vector<1x64xf32> to vector<1x1x64xf32>
    %17 = vector.broadcast %16 : vector<1x1x64xf32> to vector<1x8x64xf32>
    %18 = arith.addf %15, %17 : vector<1x8x64xf32>
    %c0_15 = arith.constant 0 : index
    %c0_16 = arith.constant 0 : index
    %c0_17 = arith.constant 0 : index
    %19 = vector.load %arg6[%c0_15, %c0_16, %c0_17] : memref<1x8x64xf32, #tpu.memory_space<vmem>>, vector<1x8x64xf32>
    tpu.vector_store %arg6[%c0_15, %c0_16, %c0_17], %18 {strides = array<i32>} : memref<1x8x64xf32, #tpu.memory_space<vmem>>, vector<1x8x64xf32>,
    return
  }
  func.func @transform_0(%arg0: i32) -> (i32, i32, i32) {
    %c0_i32 = arith.constant 0 : i32
    %c0_i32_0 = arith.constant 0 : i32
    %c0_i32_1 = arith.constant 0 : i32
    return %arg0, %c0_i32, %c0_i32_0 : i32, i32, i32
  }
  func.func @transform_1(%arg0: i32) -> (i32, i32) {
    %c0_i32 = arith.constant 0 : i32
    %c0_i32_0 = arith.constant 0 : i32
    %c0_i32_1 = arith.constant 0 : i32
    return %c0_i32, %c0_i32_0 : i32, i32
  }
  func.func @transform_2(%arg0: i32) -> (i32, i32) {
    %c0_i32 = arith.constant 0 : i32
    %c0_i32_0 = arith.constant 0 : i32
    %c0_i32_1 = arith.constant 0 : i32
    return %c0_i32, %c0_i32_0 : i32, i32
  }
  func.func @transform_3(%arg0: i32) -> (i32, i32) {
    %c0_i32 = arith.constant 0 : i32
    %c0_i32_0 = arith.constant 0 : i32
    %c0_i32_1 = arith.constant 0 : i32
    return %c0_i32, %c0_i32_0 : i32, i32
  }
  func.func @transform_4(%arg0: i32) -> (i32, i32) {
    %c0_i32 = arith.constant 0 : i32
    %c0_i32_0 = arith.constant 0 : i32
    %c0_i32_1 = arith.constant 0 : i32
    return %c0_i32, %c0_i32_0 : i32, i32
  }
  func.func @transform_5(%arg0: i32) -> (i32, i32, i32) {
    %c0_i32 = arith.constant 0 : i32
    %c0_i32_0 = arith.constant 0 : i32
    %c0_i32_1 = arith.constant 0 : i32
    return %arg0, %c0_i32, %c0_i32_0 : i32, i32, i32
  }
}

</mosaic_0001>

<bundles_post_ra>
// kernel: apply.1
= control target key start
LH: loop header
LB: loop body
LE: loop exit
PB: predicated region body
PF: predicated region fallthrough
CT: control target
= control target key end

     0   :  { %10 = vsyncpa [#allocation3], 0  ;;  %s665_s0 = inlined_call_operand.hbm [shape: f32[1,8,32], index: 0, kind: input, shape index: {}]   ;;  %s666_s1 = inlined_call_operand.hbm [shape: f32[32,64], index: 1, kind: input, shape index: {}]   ;;  %s667_s2 = inlined_call_operand.hbm [shape: f32[32,64], index: 2, kind: input, shape index: {}]   ;;  %s668_s3 = inlined_call_operand.hbm [shape: f32[32,64], index: 3, kind: input, shape index: {}]   ;;  %s669_s4 = inlined_call_operand.vmem [shape: f32[1,64], index: 4, kind: input, shape index: {}]   ;;  %s670_s5 = inlined_call_operand.hbm [shape: f32[1,8,64], index: 5, kind: output, shape index: {}]  }
   0x1   :  { %11 = vsyncpa [#allocation6], 0 }
   0x2   :  { %12 = vsyncpa [#allocation9], 0 }
   0x3   :  { %13 = vsyncpa [#allocation4], 0  ;;  %s545_s18 = smov [#allocation5]   ;;  %s427_s22 = scalar_lea.hbm %s666_s1, 512 }
   0x4   :  { %s29_s19 = sshll.u32 %s545_s18, 4  ;;  %p428_p0 = scmp.ne.s32.totalorder %s666_s1, %s427_s22  ;;  %s30_s19 = int_to_ptr.vmem [resolvable:$true] %s29_s19 }
   0x5   :  { %p431_p1 = scmp.lt.u32.totalorder %s427_s22, %s666_s1 }
   0x7   :  { %p433_p2 = pnand %p431_p1, %p428_p0 }
   0x9   :  { %436 = shalt.err (!%p433_p2)
}
   0xa   :  { %s437_s27 = scalar_lea.vmem %s30_s19, 512  ;;  %p442_p4 = scmp.lt.s32.totalorder %s30_s19, %s30_s19 }
   0xb   :  { %p438_p3 = scmp.ne.s32.totalorder %s30_s19, %s437_s27  ;;  %p443_p5 = scmp.lt.s32.totalorder %s437_s27, %s437_s27 }
   0xd   :  { %p444_p6 = por %p443_p5, %p442_p4 }
   0xf   :  { %p445_p7 = pnand %p444_p6, %p438_p3 }
  0x11   :  { %448 = shalt.err (!%p445_p7)
}
  0x12   :  { %s546_s28 = smov 128   ;;  %s547_s29 = smov 8  }
  0x13   :  { %35 = dma.hbm_to_vmem [thread:$0]  %s666_s1, 512, %s30_s19, [#allocation6], %s546_s28, %s546_s28, %s547_s29  }
  0x14   :  { %s548_s7 = smov [#allocation2]   ;;  %s549_s9 = smov [#allocation7]  }
  0x15   :  { %s20_s8 = sshll.u32 %s548_s7, 4  ;;  %s41_s10 = sshll.u32 %s549_s9, 4  ;;  %s21_s8 = int_to_ptr.vmem [resolvable:$true] %s20_s8  ;;  %s42_s10 = int_to_ptr.vmem [resolvable:$true] %s41_s10 }
  0x16   :  { %s449_s13 = scalar_lea.hbm %s665_s0, 128 }
  0x17   :  { %p450_p8 = scmp.ne.s32.totalorder %s665_s0, %s449_s13  ;;  %p453_p9 = scmp.lt.u32.totalorder %s449_s13, %s665_s0 }
  0x19   :  { %p455_p10 = pnand %p453_p9, %p450_p8 }
  0x1b   :  { %458 = shalt.err (!%p455_p10)
}
  0x1c   :  { %s459_s1 = scalar_lea.vmem %s21_s8, 128  ;;  %p464_p12 = scmp.lt.s32.totalorder %s21_s8, %s21_s8 }
  0x1d   :  { %p460_p11 = scmp.ne.s32.totalorder %s21_s8, %s459_s1  ;;  %p465_p13 = scmp.lt.s32.totalorder %s459_s1, %s459_s1 }
  0x1f   :  { %p466_p0 = por %p465_p13, %p464_p12 }
  0x21   :  { %p467_p1 = pnand %p466_p0, %p460_p11 }
  0x23   :  { %470 = shalt.err (!%p467_p1)
}
  0x24   :  { %23 = dma.hbm_to_vmem [thread:$0]  %s665_s0, 128, %s21_s8, [#allocation3]  }
  0x25   :  { %s471_s22 = scalar_lea.hbm %s667_s2, 512 }
  0x26   :  { %p472_p2 = scmp.ne.s32.totalorder %s667_s2, %s471_s22  ;;  %p475_p3 = scmp.lt.u32.totalorder %s471_s22, %s667_s2 }
  0x28   :  { %p477_p4 = pnand %p475_p3, %p472_p2 }
  0x2a   :  { %480 = shalt.err (!%p477_p4)
}
  0x2b   :  { %s481_s27 = scalar_lea.vmem %s42_s10, 512  ;;  %p486_p6 = scmp.lt.s32.totalorder %s42_s10, %s42_s10 }
  0x2c   :  { %p482_p5 = scmp.ne.s32.totalorder %s42_s10, %s481_s27  ;;  %p487_p7 = scmp.lt.s32.totalorder %s481_s27, %s481_s27 }
  0x2e   :  { %p488_p8 = por %p487_p7, %p486_p6 }
  0x30   :  { %p489_p9 = pnand %p488_p8, %p482_p5 }
  0x32   :  { %492 = shalt.err (!%p489_p9)
}
  0x33   :  { %47 = dma.hbm_to_vmem [thread:$0]  %s667_s2, 512, %s42_s10, [#allocation6], %s546_s28, %s546_s28, %s547_s29  }
  0x34   :  { %s550_s6 = smov [#allocation8]   ;;  %s493_s11 = scalar_lea.hbm %s668_s3, 512 }
  0x35   :  { %s53_s7 = sshll.u32 %s550_s6, 4  ;;  %p494_p10 = scmp.ne.s32.totalorder %s668_s3, %s493_s11  ;;  %s54_s7 = int_to_ptr.vmem [resolvable:$true] %s53_s7 }
  0x36   :  { %p497_p11 = scmp.lt.u32.totalorder %s493_s11, %s668_s3 }
  0x38   :  { %p499_p12 = pnand %p497_p11, %p494_p10 }
  0x3a   :  { %502 = shalt.err (!%p499_p12)
}
  0x3b   :  { %s503_s16 = scalar_lea.vmem %s54_s7, 512  ;;  %p508_p0 = scmp.lt.s32.totalorder %s54_s7, %s54_s7 }
  0x3c   :  { %p504_p13 = scmp.ne.s32.totalorder %s54_s7, %s503_s16  ;;  %p509_p1 = scmp.lt.s32.totalorder %s503_s16, %s503_s16 }
  0x3e   :  { %p510_p2 = por %p509_p1, %p508_p0 }
  0x40   :  { %p511_p3 = pnand %p510_p2, %p504_p13 }
  0x42   :  { %514 = shalt.err (!%p511_p3)
}
  0x43   :  { %59 = dma.hbm_to_vmem [thread:$0]  %s668_s3, 512, %s54_s7, [#allocation9], %s546_s28, %s546_s28, %s547_s29  }
  0x44   :  { %537 = dma.done.wait [#allocation3], 128  }
  0x45   :  { %538 = vsyncadd [#allocation3], 4294967168 }
  0x46   :  { %539 = dma.done.wait [#allocation6], 1024  }
  0x47   :  { %540 = vsyncadd [#allocation6], 4294966272 }
  0x48   :  { %541 = dma.done.wait [#allocation9], 512  }
  0x49   :  { %542 = vsyncadd [#allocation9], 4294966784  ;;  %v551_v0 = vmov 0.0|0.0   ;;  %vm552_vm0 = vmmov 0   ;;  %v553_v1 = vmov 0.0   ;;  %v95_v2 = vld [vmem:[#allocation8] sm:$0xff]  ;;  %v324_v36 = vlaneseq }
  0x4a   :  { %399 = vmatprep.subr.bf16.mxu0 %v551_v0  ;;  %405 = vmatprep.subr.bf16.mxu1 %v551_v0  ;;  %v96_v3 = vld [vmem:[#allocation8 + $0x8] sm:$0xff]  ;;  %v91_v4 = vld [vmem:[#allocation7] sm:$0xff]  ;;  %vm75_vm1 = vcmask 261120   ;;  %v97_v7 = vld [vmem:[#allocation8 + $0x10] sm:$0xff]  ;;  %s554_s29 = smov [#allocation10]   ;;  %vm329_vm2 = vcmask 523264  }
  0x4b   :  { %374 = vmatprep.mubr.msk.f32.mxu0 %vm552_vm0, %v553_v1  ;;  %385 = vmatprep.mubr.msk.f32.mxu1 %vm552_vm0, %v553_v1  ;;  %v400_v5 = vpack.c.bf16 %v96_v3, %v95_v2  ;;  %v92_v6 = vld [vmem:[#allocation7 + $0x8] sm:$0xff]  ;;  %v98_v8 = vld [vmem:[#allocation8 + $0x18] sm:$0xff]  ;;  %v93_v10 = vld [vmem:[#allocation7 + $0x10] sm:$0xff]  ;;  %v325_v37 = vshrl.u32 %v324_v36, 7  ;;  %s337_s17 = sshll.u32 %s554_s29, 4  ;;  %s338_s17 = int_to_ptr.vmem [resolvable:$true] %s337_s17 }
  0x4c   :  { %v406_v9 = vpack.c.bf16 %v92_v6, %v91_v4  ;;  %v94_v11 = vld [vmem:[#allocation7 + $0x18] sm:$0xff]  ;;  %v403_v13 = vpack.c.bf16 %v98_v8, %v97_v7  ;;  %v247_v27 = vld [vmem:[#allocation5] sm:$0xff]  ;;  %v248_v28 = vld [vmem:[#allocation5 + $0x8] sm:$0xff]  ;;  %s515_s1 = scalar_lea.vmem %s338_s17, 128  ;;  %p520_p5 = scmp.lt.s32.totalorder %s338_s17, %s338_s17 }
  0x4d   :  { %v74_v12 = vld [vmem:[#allocation2] sm:$0xff]  ;;  %401 = vmatpush3.bf16.msra.mxu0 %v400_v5  ;;  %v409_v16 = vpack.c.bf16 %v94_v11, %v93_v10  ;;  %v412_v31 = vpack.c.bf16 %v248_v28, %v247_v27  ;;  %v249_v33 = vld [vmem:[#allocation5 + $0x10] sm:$0xff]  ;;  %v326_v44 = vsub.s32 0, %v325_v37  ;;  %p516_p4 = scmp.ne.s32.totalorder %s338_s17, %s515_s1  ;;  %p521_p6 = scmp.lt.s32.totalorder %s515_s1, %s515_s1 }
  0x4e   :  { %v76_v14 = vsel %vm75_vm1, %v74_v12, -inf  ;;  %v83_v15 = vsel %vm75_vm1, %v74_v12, 0.0  ;;  %407 = vmatpush3.bf16.msra.mxu1 %v406_v9  ;;  %402 = vmatprep.subr.bf16.mxu0 %v551_v0  ;;  %v250_v34 = vld [vmem:[#allocation5 + $0x18] sm:$0xff] }
  0x4f   :  { %v77_v17 = vrot.slane %v76_v14, 4  ;;  %v84_v18 = vrot.slane %v83_v15, 4  ;;  %408 = vmatprep.subr.bf16.mxu1 %v551_v0  ;;  %v415_v35 = vpack.c.bf16 %v250_v34, %v249_v33  ;;  %v245_v41 = vld [vmem:[%s669_s4] sm:$0x1]  ;;  %p522_p7 = por %p521_p6, %p520_p5 }
  0x51   :  { %v85_v19 = vadd.f32 %v84_v18, %v83_v15  ;;  %v78_v20 = vmax.f32 %v76_v14, %v77_v17  ;;  %404 = vmatpush3.bf16.msra.mxu0 %v403_v13  ;;  %p523_p8 = pnand %p522_p7, %p516_p4 }
  0x52   :  { %410 = vmatpush3.bf16.msra.mxu1 %v409_v16  ;;  %411 = vmatprep.subr.bf16.mxu0 %v551_v0 }
  0x53   :  { %v86_v21 = vrot.slane %v85_v19, 2  ;;  %v79_v22 = vrot.slane %v78_v20, 2 }
  0x55   :  { %v87_v23 = vadd.f32 %v86_v21, %v85_v19  ;;  %v80_v24 = vmax.f32 %v78_v20, %v79_v22 }
  0x57   :  { %v88_v25 = vrot.slane %v87_v23, 1  ;;  %v81_v26 = vrot.slane %v80_v24, 1 }
  0x59   :  { %v89_v29 = vadd.f32 %v88_v25, %v87_v23  ;;  %v82_v30 = vmax.f32 %v80_v24, %v81_v26 }
  0x5b   :  { %v90_v32 = vmul.f32 0.125, %v89_v29  ;;  %386 = vmatmul.mubr.msk.f32.vlgmr.msra.gmra.mrb[0].mxu1 %vm75_vm1, %v82_v30 }
  0x5d   :  { %375 = vmatmul.mubr.msk.f32.vlgmr.msra.gmra.mrb[0].mxu0 %vm75_vm1, %v90_v32 }
  0x5e   :  { %413 = vmatpush3.bf16.msra.mxu0 %v412_v31  ;;  %396 = vmatprep.mubr.msk.f32.mxu0 %vm552_vm0, %v553_v1 }
  0x5f   :  { %414 = vmatprep.subr.bf16.mxu0 %v551_v0 }
  0x62   :  { %416 = vmatpush3.bf16.msra.mxu0 %v415_v35 }
  0x65   :  { %397 = vmatmul.mubr.msk.f32.vlgmr.msra.gmra.mrb[2].mxu0 %vm75_vm1, %v74_v12 }
 0x12e   :  { %v241_v38 = vpop.f32.mrb[0].mxu1 }
 0x12f   :  { %v387_v39 = vpop.f32.mrb[1].mxu1 }
 0x130   :  { %v168_v40 = vpop.f32.mrb[0].mxu0 }
 0x131   :  { %v242_v42 = vadd.f32 %v241_v38, %v168_v40  ;;  %v376_v43 = vpop.f32.mrb[1].mxu0 }
 0x133   :  { %v246_v45 = vadd.f32 %v245_v41, %v242_v42 }
 0x135   :  { %v327_v46 = vrot.slane %v246_v45, %v326_v44 }
 0x138   :  { %v320_v47 = vpop.f32.mrb[2].mxu0 }
 0x139   :  { %v328_v48 = vadd.f32 %v327_v46, %v320_v47  ;;  %v398_v49 = vpop.f32.mrb[3].mxu0 }
 0x13b   :  { %330 = vst.msk [vmem:[#allocation10] sm:$0xff] %vm329_vm2, %v328_v48 }
 0x13c   :  { %526 = shalt.err (!%p523_p8)
}
 0x13d   :  { %s527_s19 = scalar_lea.hbm %s670_s5, 128 }
 0x13e   :  { %p528_p9 = scmp.ne.s32.totalorder %s670_s5, %s527_s19  ;;  %p531_p10 = scmp.lt.u32.totalorder %s527_s19, %s670_s5 }
 0x140   :  { %p533_p11 = pnand %p531_p10, %p528_p9 }
 0x142   :  { %536 = shalt.err (!%p533_p11)
}
 0x143   :  { %340 = dma.vmem_to_hbm [thread:$0]  %s338_s17, 128, %s670_s5, [#allocation4]  }
 0x144   :  { %543 = dma.done.wait [#allocation4], 128  }
 0x145   :  { %544 = vsyncadd [#allocation4], 4294967168 }
 0x146   :  { %344 = vsyncpa [#allocation3], 1 }
 0x147   :  { %345 = vsyncpa [#allocation6], 1 }
 0x148   :  { %346 = vsyncpa [#allocation9], 1 }
 0x149   :  { %347 = vsyncpa [#allocation4], 1 }

</bundles_post_ra>
